<compile_context>
chip_gen: v6e
topology: v6e:2x2x1
jax: 0.10.0
libtpu: 0.0.40
codegen_flags: <defaults>
</compile_context>

<pallas_src>
import numpy as np
import jax
import jax.numpy as jnp
from jax import lax
from jax.experimental import pallas as pl
from jax.experimental.pallas import tpu as pltpu

H = 7
W = 7
P = H * W            # 49 flattened spatial positions
C_IN = 16
C_MID = 32
C_OUT = 8


# ---------------------------------------------------------------------------
# Pallas kernel: one batched affine map on the MXU.
# ---------------------------------------------------------------------------
def _affine_kernel(x_ref, a_ref, b_ref, o_ref):
    # x_ref : [tile_n, 784]   a_ref : [784, 392]   b_ref : [1, 392]
    o_ref[...] = (
        jnp.dot(x_ref[...], a_ref[...], preferred_element_type=jnp.float32)
        + b_ref[...]
    )


# ---------------------------------------------------------------------------
# Host-side one-time composition of the full forward into (A, b), in float64.
# ---------------------------------------------------------------------------
def _build_shift_matrices_np():
    # p2d[t, q, p] = 1 iff input flat-position q feeds output flat-position p
    # for 3x3 tap t=(kh,kw), padding=1 (zeros outside the 7x7 image).
    p2d = np.zeros((9, P, P), np.float64)
    for kh in range(3):
        for kw in range(3):
            t = kh * 3 + kw
            dh, dw = kh - 1, kw - 1
            for ph in range(H):
                for pw in range(W):
                    qh, qw = ph + dh, pw + dw
                    if 0 <= qh < H and 0 <= qw < W:
                        p2d[t, qh * W + qw, ph * W + pw] = 1.0
    # p1d[k, q, p] = 1 iff sequence position q = p + k - 1 (Conv1d, pad=1, len 49).
    p1d = np.zeros((3, P, P), np.float64)
    for k in range(3):
        d = k - 1
        for pp in range(P):
            q = pp + d
            if 0 <= q < P:
                p1d[k, q, pp] = 1.0
    return p2d, p1d


def prepare_params(raw):
    """Precompose input_conv -> branch_a_1D -> out_conv into out = x @ A^T + b.

    Activations are [C, 49] matrices vectorized row-major (index = c*49 + p,
    i.e. exactly x.reshape(N, C*49)).  Each conv layer is
        Y = sum_tap  W_tap @ X @ P_tap  + bias
    so its linear map on vec(X) is  sum_tap kron(W_tap, P_tap^T).
    Composition is done in float64 on the host; the kernel sees only f32 A, b.
    """
    p2d, p1d = _build_shift_matrices_np()
    w2d = np.asarray(raw["input_conv_w"], np.float64)            # [32,16,3,3]
    b2d = np.asarray(raw["input_conv_b"], np.float64)            # [32]
    w1d = np.asarray(raw["branch_a_w"], np.float64)              # [32,32,3]
    b1d = np.asarray(raw["branch_a_b"], np.float64)              # [32]
    wout = np.asarray(raw["out_conv_w"], np.float64).reshape(C_OUT, C_MID)
    bout = np.asarray(raw["out_conv_b"], np.float64)             # [8]

    # input_conv: [16*49] -> [32*49]
    L1 = np.zeros((C_MID * P, C_IN * P), np.float64)
    for kh in range(3):
        for kw in range(3):
            t = kh * 3 + kw
            L1 += np.kron(w2d[:, :, kh, kw], p2d[t].T)
    B1 = np.repeat(b2d, P)                                       # [1568]

    # branch_a_1D: [32*49] -> [32*49]
    L2 = np.zeros((C_MID * P, C_MID * P), np.float64)
    for k in range(3):
        L2 += np.kron(w1d[:, :, k], p1d[k].T)
    B2 = np.repeat(b1d, P)                                       # [1568]

    # out_conv (1x1): [32*49] -> [8*49]
    L3 = np.kron(wout, np.eye(P))                                # [392, 1568]
    B3 = np.repeat(bout, P)                                      # [392]

    A = L3 @ (L2 @ L1)                                           # [392, 784]
    b = L3 @ (L2 @ B1 + B2) + B3                                 # [392]

    return {
        "a_t": jnp.asarray(A.T, jnp.float32),                    # [784, 392]
        "bias": jnp.asarray(b.reshape(1, C_OUT * P), jnp.float32),
    }
    # TODO(synk): the optional with_2d=True branch (branch_b_2D) of the module is
    # not exercised by the default constructor and is not composed here.


# ---------------------------------------------------------------------------
# Parameters in the PyTorch layouts.
# ---------------------------------------------------------------------------
def init_params(key):
    ks = jax.random.split(key, 6)
    s = 0.05
    return {
        "input_conv_w": s * jax.random.normal(ks[0], (C_MID, C_IN, 3, 3), jnp.float32),
        "input_conv_b": s * jax.random.normal(ks[1], (C_MID,), jnp.float32),
        "branch_a_w":   s * jax.random.normal(ks[2], (C_MID, C_MID, 3), jnp.float32),
        "branch_a_b":   s * jax.random.normal(ks[3], (C_MID,), jnp.float32),
        "out_conv_w":   s * jax.random.normal(ks[4], (C_OUT, C_MID, 1, 1), jnp.float32),
        "out_conv_b":   s * jax.random.normal(ks[5], (C_OUT,), jnp.float32),
    }


# ---------------------------------------------------------------------------
# Forward (with_2d=False path of the module — the default constructor).
# ---------------------------------------------------------------------------
def conv_1d_forward(prep, x):
    # x: [N, 16, 7, 7] NCHW. Pure reshape (no transposes) to [N, 784].
    n = x.shape[0]
    x_flat = x.reshape(n, C_IN * P)

    # Batch tile: a parallel grid axis lets v7x's two TensorCores split the
    # batch (and double-buffer x/out) when it tiles cleanly into (8,128)-legal
    # blocks.  The module's N=4 runs as one grid step (full-array block).
    if n % 8 == 0 and n >= 16:
        tile_n = n // 2 if (n // 2) % 8 == 0 else 8
    else:
        tile_n = n
    grid = (n // tile_n,)

    out = pl.pallas_call(
        _affine_kernel,
        out_shape=jax.ShapeDtypeStruct((n, C_OUT * P), jnp.float32),
        grid=grid,
        in_specs=[
            pl.BlockSpec((tile_n, C_IN * P), lambda i: (i, 0)),
            pl.BlockSpec((C_IN * P, C_OUT * P), lambda i: (0, 0)),   # A^T resident
            pl.BlockSpec((1, C_OUT * P), lambda i: (0, 0)),          # bias resident
        ],
        out_specs=pl.BlockSpec((tile_n, C_OUT * P), lambda i: (i, 0)),
        compiler_params=pltpu.CompilerParams(
            dimension_semantics=("parallel",)),
    )(x_flat, prep["a_t"], prep["bias"])
    return out.reshape(n, C_OUT, H, W)


# ---------------------------------------------------------------------------
# Plain-XLA reference (for correctness checking only).
# ---------------------------------------------------------------------------
def reference_forward(raw, x):
    hp = lax.Precision.HIGHEST
    step0 = lax.conv_general_dilated(
        x, raw["input_conv_w"], window_strides=(1, 1), padding=((1, 1), (1, 1)),
        dimension_numbers=("NCHW", "OIHW", "NCHW"), precision=hp)
    step0 = step0 + raw["input_conv_b"][None, :, None, None]
    n, c, h, w = step0.shape
    seq = step0.reshape(n, c, h * w)[:, :, :, None]                  # [N, 32, 49, 1]
    k1d = raw["branch_a_w"][:, :, :, None]                           # [32, 32, 3, 1]
    step1 = lax.conv_general_dilated(
        seq, k1d, window_strides=(1, 1), padding=((1, 1), (0, 0)),
        dimension_numbers=("NCHW", "OIHW", "NCHW"), precision=hp)[:, :, :, 0]
    step1 = (step1 + raw["branch_a_b"][None, :, None]).reshape(n, c, h, w)
    out = lax.conv_general_dilated(
        step1, raw["out_conv_w"], window_strides=(1, 1), padding=((0, 0), (0, 0)),
        dimension_numbers=("NCHW", "OIHW", "NCHW"), precision=hp)
    return out + raw["out_conv_b"][None, :, None, None]


if __name__ == "__main__":
    key = jax.random.PRNGKey(0)
    pkey, xkey = jax.random.split(key)
    raw = init_params(pkey)
    prep = prepare_params(raw)

    # Module's declared input shape: [4, 16, 7, 7] (NCHW).
    x = jax.random.normal(xkey, (4, 16, 7, 7), jnp.float32)

    fwd = jax.jit(conv_1d_forward)
    out = fwd(prep, x)
    jax.block_until_ready(out)

    assert out.shape == (4, 8, 7, 7), out.shape
    assert out.dtype == jnp.float32

    ref = reference_forward(raw, x)
    np.testing.assert_allclose(np.asarray(out), np.asarray(ref), rtol=1e-3, atol=1e-4)

    print("KERNEL_OK")
</pallas_src>

<mosaic_0001>
module attributes {stable_mosaic.version = 11 : i64} {
  func.func @_affine_kernel(%arg0: i32, %arg1: memref<4x784xf32, #tpu.memory_space<vmem>>, %arg2: memref<784x392xf32, #tpu.memory_space<vmem>>, %arg3: memref<1x392xf32, #tpu.memory_space<vmem>>, %arg4: memref<4x392xf32, #tpu.memory_space<vmem>>) attributes {dimension_semantics = [#tpu.dimension_semantics<parallel>], iteration_bounds = array<i64: 1>, scalar_prefetch = 0 : i64, scratch_operands = 0 : i64, tpu.core_type = #tpu.core_type<tc>, window_params = [{transform_indices = @transform_0, window_bounds = array<i64: 4, 784>}, {pipeline_mode = #tpu.pipeline_mode<synchronous>, transform_indices = @transform_1, window_bounds = array<i64: 784, 392>}, {pipeline_mode = #tpu.pipeline_mode<synchronous>, transform_indices = @transform_2, window_bounds = array<i64: 1, 392>}, {transform_indices = @transform_3, window_bounds = array<i64: 4, 392>}]} {
    %c0 = arith.constant 0 : index
    %c0_0 = arith.constant 0 : index
    %0 = vector.load %arg1[%c0, %c0_0] : memref<4x784xf32, #tpu.memory_space<vmem>>, vector<4x784xf32>
    %c0_1 = arith.constant 0 : index
    %c0_2 = arith.constant 0 : index
    %1 = vector.load %arg2[%c0_1, %c0_2] : memref<784x392xf32, #tpu.memory_space<vmem>>, vector<784x392xf32>
    %cst = arith.constant dense<0.000000e+00> : vector<4x392xf32>
    %2 = tpu.matmul %0, %1, %cst {dimension_numbers = #tpu.dot_dimension_numbers<[1], [0], [0], [1], [0, 0, 1, 1], [], []>} : vector<4x784xf32>, vector<784x392xf32>, vector<4x392xf32> -> vector<4x392xf32>
    %c0_3 = arith.constant 0 : index
    %c0_4 = arith.constant 0 : index
    %3 = vector.load %arg3[%c0_3, %c0_4] : memref<1x392xf32, #tpu.memory_space<vmem>>, vector<1x392xf32>
    %4 = vector.broadcast %3 : vector<1x392xf32> to vector<4x392xf32>
    %5 = arith.addf %2, %4 : vector<4x392xf32>
    %c0_5 = arith.constant 0 : index
    %c0_6 = arith.constant 0 : index
    %6 = vector.load %arg4[%c0_5, %c0_6] : memref<4x392xf32, #tpu.memory_space<vmem>>, vector<4x392xf32>
    tpu.vector_store %arg4[%c0_5, %c0_6], %5 {strides = array<i32>} : memref<4x392xf32, #tpu.memory_space<vmem>>, vector<4x392xf32>,
    return
  }
  func.func @transform_0(%arg0: i32) -> (i32, i32) {
    %c0_i32 = arith.constant 0 : i32
    %c0_i32_0 = arith.constant 0 : i32
    return %arg0, %c0_i32 : i32, i32
  }
  func.func @transform_1(%arg0: i32) -> (i32, i32) {
    %c0_i32 = arith.constant 0 : i32
    %c0_i32_0 = arith.constant 0 : i32
    %c0_i32_1 = arith.constant 0 : i32
    return %c0_i32, %c0_i32_0 : i32, i32
  }
  func.func @transform_2(%arg0: i32) -> (i32, i32) {
    %c0_i32 = arith.constant 0 : i32
    %c0_i32_0 = arith.constant 0 : i32
    %c0_i32_1 = arith.constant 0 : i32
    return %c0_i32, %c0_i32_0 : i32, i32
  }
  func.func @transform_3(%arg0: i32) -> (i32, i32) {
    %c0_i32 = arith.constant 0 : i32
    %c0_i32_0 = arith.constant 0 : i32
    return %arg0, %c0_i32 : i32, i32
  }
}

</mosaic_0001>

<bundles_post_ra>
// kernel: conv_1d_forward.1
= control target key start
LH: loop header
LB: loop body
LE: loop exit
PB: predicated region body
PF: predicated region fallthrough
CT: control target
= control target key end

     0   :  { %vm442_vm0 = vcmask 130048   ;;  %vm1022_vm1 = vcmask 1043456   ;;  %vm1023_vm2 = vcmask 64516   ;;  %s2290_s1 = inlined_call_operand.vmem [shape: f32[784,392], index: 1, kind: input, shape index: {}]   ;;  %s2291_s0 = inlined_call_operand.vmem [shape: f32[4,784], index: 0, kind: input, shape index: {}]   ;;  %s2292_s2 = inlined_call_operand.vmem [shape: f32[1,392], index: 2, kind: input, shape index: {}]   ;;  %s2293_s3 = inlined_call_operand.vmem [shape: f32[4,392], index: 3, kind: output, shape index: {}]  }
   0x1   :  { %v79_v0 = vld [vmem:[%s2290_s1 + $0x1e8] sm:$0xff]  ;;  %v78_v2 = vld [vmem:[%s2290_s1 + $0x1e0] sm:$0xff]  ;;  %vm1024_vm3 = vmor %vm1023_vm2, %vm1022_vm1 }
   0x2   :  { %v207_v1 = vld [vmem:[%s2290_s1 + $0x5e8] sm:$0xff]  ;;  %445 = vmatprep.subr.mxu0 %v79_v0  ;;  %v206_v3 = vld [vmem:[%s2290_s1 + $0x5e0] sm:$0xff] }
   0x3   :  { %516 = vmatprep.subr.mxu1 %v207_v1  ;;  %v75_v4 = vld [vmem:[%s2290_s1 + $0x1c8] sm:$0xff]  ;;  %446 = vmatpush1.msra.mxu0 %v78_v2  ;;  %v74_v6 = vld [vmem:[%s2290_s1 + $0x1c0] sm:$0xff] }
   0x4   :  { %v203_v5 = vld [vmem:[%s2290_s1 + $0x5c8] sm:$0xff]  ;;  %517 = vmatpush1.msra.mxu1 %v206_v3  ;;  %v202_v7 = vld [vmem:[%s2290_s1 + $0x5c0] sm:$0xff]  ;;  %447 = vmatprep.subr.mxu0 %v75_v4 }
   0x5   :  { %v71_v8 = vld [vmem:[%s2290_s1 + $0x1a8] sm:$0xff]  ;;  %518 = vmatprep.subr.mxu1 %v203_v5  ;;  %v70_v10 = vld [vmem:[%s2290_s1 + $0x1a0] sm:$0xff]  ;;  %448 = vmatpush1.msra.mxu0 %v74_v6 }
   0x6   :  { %v199_v9 = vld [vmem:[%s2290_s1 + $0x5a8] sm:$0xff]  ;;  %v198_v11 = vld [vmem:[%s2290_s1 + $0x5a0] sm:$0xff]  ;;  %519 = vmatpush1.msra.mxu1 %v202_v7  ;;  %449 = vmatprep.subr.mxu0 %v71_v8 }
   0x7   :  { %v67_v12 = vld [vmem:[%s2290_s1 + $0x188] sm:$0xff]  ;;  %520 = vmatprep.subr.mxu1 %v199_v9  ;;  %v66_v14 = vld [vmem:[%s2290_s1 + $0x180] sm:$0xff]  ;;  %450 = vmatpush1.msra.mxu0 %v70_v10 }
   0x8   :  { %v195_v13 = vld [vmem:[%s2290_s1 + $0x588] sm:$0xff]  ;;  %v194_v15 = vld [vmem:[%s2290_s1 + $0x580] sm:$0xff]  ;;  %521 = vmatpush1.msra.mxu1 %v198_v11  ;;  %451 = vmatprep.subr.mxu0 %v67_v12 }
   0x9   :  { %v63_v16 = vld [vmem:[%s2290_s1 + $0x168] sm:$0xff]  ;;  %522 = vmatprep.subr.mxu1 %v195_v13  ;;  %v62_v18 = vld [vmem:[%s2290_s1 + $0x160] sm:$0xff]  ;;  %452 = vmatpush1.msra.mxu0 %v66_v14 }
   0xa   :  { %v191_v17 = vld [vmem:[%s2290_s1 + $0x568] sm:$0xff]  ;;  %v190_v19 = vld [vmem:[%s2290_s1 + $0x560] sm:$0xff]  ;;  %523 = vmatpush1.msra.mxu1 %v194_v15  ;;  %453 = vmatprep.subr.mxu0 %v63_v16 }
   0xb   :  { %v59_v20 = vld [vmem:[%s2290_s1 + $0x148] sm:$0xff]  ;;  %524 = vmatprep.subr.mxu1 %v191_v17  ;;  %v58_v22 = vld [vmem:[%s2290_s1 + $0x140] sm:$0xff]  ;;  %454 = vmatpush1.msra.mxu0 %v62_v18 }
   0xc   :  { %v187_v21 = vld [vmem:[%s2290_s1 + $0x548] sm:$0xff]  ;;  %v186_v23 = vld [vmem:[%s2290_s1 + $0x540] sm:$0xff]  ;;  %525 = vmatpush1.msra.mxu1 %v190_v19  ;;  %455 = vmatprep.subr.mxu0 %v59_v20 }
   0xd   :  { %v55_v24 = vld [vmem:[%s2290_s1 + $0x128] sm:$0xff]  ;;  %526 = vmatprep.subr.mxu1 %v187_v21  ;;  %v54_v26 = vld [vmem:[%s2290_s1 + $0x120] sm:$0xff]  ;;  %456 = vmatpush1.msra.mxu0 %v58_v22 }
   0xe   :  { %v183_v25 = vld [vmem:[%s2290_s1 + $0x528] sm:$0xff]  ;;  %v182_v27 = vld [vmem:[%s2290_s1 + $0x520] sm:$0xff]  ;;  %527 = vmatpush1.msra.mxu1 %v186_v23  ;;  %457 = vmatprep.subr.mxu0 %v55_v24 }
   0xf   :  { %v51_v28 = vld [vmem:[%s2290_s1 + $0x108] sm:$0xff]  ;;  %528 = vmatprep.subr.mxu1 %v183_v25  ;;  %v50_v30 = vld [vmem:[%s2290_s1 + $0x100] sm:$0xff]  ;;  %458 = vmatpush1.msra.mxu0 %v54_v26 }
  0x10   :  { %v179_v29 = vld [vmem:[%s2290_s1 + $0x508] sm:$0xff]  ;;  %v178_v31 = vld [vmem:[%s2290_s1 + $0x500] sm:$0xff]  ;;  %529 = vmatpush1.msra.mxu1 %v182_v27  ;;  %459 = vmatprep.subr.mxu0 %v51_v28 }
  0x11   :  { %v47_v32 = vld [vmem:[%s2290_s1 + $0xe8] sm:$0xff]  ;;  %530 = vmatprep.subr.mxu1 %v179_v29  ;;  %v46_v34 = vld [vmem:[%s2290_s1 + $0xe0] sm:$0xff]  ;;  %460 = vmatpush1.msra.mxu0 %v50_v30 }
  0x12   :  { %v175_v33 = vld [vmem:[%s2290_s1 + $0x4e8] sm:$0xff]  ;;  %v174_v35 = vld [vmem:[%s2290_s1 + $0x4e0] sm:$0xff]  ;;  %531 = vmatpush1.msra.mxu1 %v178_v31  ;;  %461 = vmatprep.subr.mxu0 %v47_v32 }
  0x13   :  { %v43_v36 = vld [vmem:[%s2290_s1 + $0xc8] sm:$0xff]  ;;  %532 = vmatprep.subr.mxu1 %v175_v33  ;;  %v42_v38 = vld [vmem:[%s2290_s1 + $0xc0] sm:$0xff]  ;;  %462 = vmatpush1.msra.mxu0 %v46_v34 }
  0x14   :  { %v171_v37 = vld [vmem:[%s2290_s1 + $0x4c8] sm:$0xff]  ;;  %v170_v39 = vld [vmem:[%s2290_s1 + $0x4c0] sm:$0xff]  ;;  %533 = vmatpush1.msra.mxu1 %v174_v35  ;;  %463 = vmatprep.subr.mxu0 %v43_v36 }
  0x15   :  { %v39_v40 = vld [vmem:[%s2290_s1 + $0xa8] sm:$0xff]  ;;  %534 = vmatprep.subr.mxu1 %v171_v37  ;;  %v38_v42 = vld [vmem:[%s2290_s1 + $0xa0] sm:$0xff]  ;;  %464 = vmatpush1.msra.mxu0 %v42_v38 }
  0x16   :  { %v167_v41 = vld [vmem:[%s2290_s1 + $0x4a8] sm:$0xff]  ;;  %v166_v43 = vld [vmem:[%s2290_s1 + $0x4a0] sm:$0xff]  ;;  %535 = vmatpush1.msra.mxu1 %v170_v39  ;;  %465 = vmatprep.subr.mxu0 %v39_v40 }
  0x17   :  { %v35_v44 = vld [vmem:[%s2290_s1 + $0x88] sm:$0xff]  ;;  %536 = vmatprep.subr.mxu1 %v167_v41  ;;  %v34_v46 = vld [vmem:[%s2290_s1 + $0x80] sm:$0xff]  ;;  %466 = vmatpush1.msra.mxu0 %v38_v42 }
  0x18   :  { %v163_v45 = vld [vmem:[%s2290_s1 + $0x488] sm:$0xff]  ;;  %v162_v47 = vld [vmem:[%s2290_s1 + $0x480] sm:$0xff]  ;;  %537 = vmatpush1.msra.mxu1 %v166_v43  ;;  %467 = vmatprep.subr.mxu0 %v35_v44 }
  0x19   :  { %v31_v48 = vld [vmem:[%s2290_s1 + $0x68] sm:$0xff]  ;;  %538 = vmatprep.subr.mxu1 %v163_v45  ;;  %v30_v50 = vld [vmem:[%s2290_s1 + $0x60] sm:$0xff]  ;;  %468 = vmatpush1.msra.mxu0 %v34_v46 }
  0x1a   :  { %v159_v49 = vld [vmem:[%s2290_s1 + $0x468] sm:$0xff]  ;;  %v158_v51 = vld [vmem:[%s2290_s1 + $0x460] sm:$0xff]  ;;  %539 = vmatpush1.msra.mxu1 %v162_v47  ;;  %469 = vmatprep.subr.mxu0 %v31_v48 }
  0x1b   :  { %v27_v52 = vld [vmem:[%s2290_s1 + $0x48] sm:$0xff]  ;;  %540 = vmatprep.subr.mxu1 %v159_v49  ;;  %v26_v54 = vld [vmem:[%s2290_s1 + $0x40] sm:$0xff]  ;;  %470 = vmatpush1.msra.mxu0 %v30_v50 }
  0x1c   :  { %v155_v53 = vld [vmem:[%s2290_s1 + $0x448] sm:$0xff]  ;;  %v154_v55 = vld [vmem:[%s2290_s1 + $0x440] sm:$0xff]  ;;  %541 = vmatpush1.msra.mxu1 %v158_v51  ;;  %471 = vmatprep.subr.mxu0 %v27_v52 }
  0x1d   :  { %v23_v56 = vld [vmem:[%s2290_s1 + $0x28] sm:$0xff]  ;;  %542 = vmatprep.subr.mxu1 %v155_v53  ;;  %v22_v58 = vld [vmem:[%s2290_s1 + $0x20] sm:$0xff]  ;;  %472 = vmatpush1.msra.mxu0 %v26_v54 }
  0x1e   :  { %v151_v57 = vld [vmem:[%s2290_s1 + $0x428] sm:$0xff]  ;;  %v150_v59 = vld [vmem:[%s2290_s1 + $0x420] sm:$0xff]  ;;  %543 = vmatpush1.msra.mxu1 %v154_v55  ;;  %473 = vmatprep.subr.mxu0 %v23_v56 }
  0x1f   :  { %v19_v60 = vld [vmem:[%s2290_s1 + $0x8] sm:$0xff]  ;;  %544 = vmatprep.subr.mxu1 %v151_v57  ;;  %v18_v62 = vld [vmem:[%s2290_s1] sm:$0xff]  ;;  %474 = vmatpush1.msra.mxu0 %v22_v58 }
  0x20   :  { %v147_v61 = vld [vmem:[%s2290_s1 + $0x408] sm:$0xff]  ;;  %v146_v63 = vld [vmem:[%s2290_s1 + $0x400] sm:$0xff]  ;;  %545 = vmatpush1.msra.mxu1 %v150_v59  ;;  %475 = vmatprep.subr.mxu0 %v19_v60 }
  0x21   :  { %v143_v0 = vld [vmem:[%s2290_s1 + $0x3e8] sm:$0xff]  ;;  %546 = vmatprep.subr.mxu1 %v147_v61  ;;  %v142_v2 = vld [vmem:[%s2290_s1 + $0x3e0] sm:$0xff]  ;;  %476 = vmatpush1.msra.mxu0 %v18_v62 }
  0x22   :  { %v271_v1 = vld [vmem:[%s2290_s1 + $0x7e8] sm:$0xff]  ;;  %v270_v3 = vld [vmem:[%s2290_s1 + $0x7e0] sm:$0xff]  ;;  %547 = vmatpush1.msra.mxu1 %v146_v63  ;;  %477 = vmatprep.subr.mxu0 %v143_v0 }
  0x23   :  { %v139_v4 = vld [vmem:[%s2290_s1 + $0x3c8] sm:$0xff]  ;;  %548 = vmatprep.subr.mxu1 %v271_v1  ;;  %v138_v6 = vld [vmem:[%s2290_s1 + $0x3c0] sm:$0xff]  ;;  %478 = vmatpush2.msra.mxu0 %v142_v2 }
  0x24   :  { %v267_v5 = vld [vmem:[%s2290_s1 + $0x7c8] sm:$0xff]  ;;  %v266_v7 = vld [vmem:[%s2290_s1 + $0x7c0] sm:$0xff]  ;;  %549 = vmatpush2.msra.mxu1 %v270_v3  ;;  %479 = vmatprep.subr.mxu0 %v139_v4 }
  0x25   :  { %v135_v8 = vld [vmem:[%s2290_s1 + $0x3a8] sm:$0xff]  ;;  %550 = vmatprep.subr.mxu1 %v267_v5  ;;  %v134_v10 = vld [vmem:[%s2290_s1 + $0x3a0] sm:$0xff]  ;;  %480 = vmatpush2.msra.mxu0 %v138_v6 }
  0x26   :  { %v263_v9 = vld [vmem:[%s2290_s1 + $0x7a8] sm:$0xff]  ;;  %v262_v11 = vld [vmem:[%s2290_s1 + $0x7a0] sm:$0xff]  ;;  %551 = vmatpush2.msra.mxu1 %v266_v7  ;;  %481 = vmatprep.subr.mxu0 %v135_v8 }
  0x27   :  { %v131_v12 = vld [vmem:[%s2290_s1 + $0x388] sm:$0xff]  ;;  %552 = vmatprep.subr.mxu1 %v263_v9  ;;  %v130_v14 = vld [vmem:[%s2290_s1 + $0x380] sm:$0xff]  ;;  %482 = vmatpush2.msra.mxu0 %v134_v10 }
  0x28   :  { %v259_v13 = vld [vmem:[%s2290_s1 + $0x788] sm:$0xff]  ;;  %v258_v15 = vld [vmem:[%s2290_s1 + $0x780] sm:$0xff]  ;;  %553 = vmatpush2.msra.mxu1 %v262_v11  ;;  %483 = vmatprep.subr.mxu0 %v131_v12 }
  0x29   :  { %v127_v16 = vld [vmem:[%s2290_s1 + $0x368] sm:$0xff]  ;;  %554 = vmatprep.subr.mxu1 %v259_v13  ;;  %v126_v18 = vld [vmem:[%s2290_s1 + $0x360] sm:$0xff]  ;;  %484 = vmatpush2.msra.mxu0 %v130_v14  ;;  %v17_v13 = vld [vmem:[%s2291_s0 + $0x18] sm:$0xf] }
  0x2a   :  { %v255_v17 = vld [vmem:[%s2290_s1 + $0x768] sm:$0xff]  ;;  %v254_v19 = vld [vmem:[%s2290_s1 + $0x760] sm:$0xff]  ;;  %555 = vmatpush2.msra.mxu1 %v258_v15  ;;  %485 = vmatprep.subr.mxu0 %v127_v16  ;;  %v81_v14 = vld [vmem:[%s2290_s1 + $0x1f8] sm:$0xff] }
  0x2b   :  { %v123_v20 = vld [vmem:[%s2290_s1 + $0x348] sm:$0xff]  ;;  %556 = vmatprep.subr.mxu1 %v255_v17  ;;  %v122_v22 = vld [vmem:[%s2290_s1 + $0x340] sm:$0xff]  ;;  %486 = vmatpush2.msra.mxu0 %v126_v18  ;;  %v80_v16 = vld [vmem:[%s2290_s1 + $0x1f0] sm:$0xff]  ;;  %v1038_v17 = vmov 0.0  }
  0x2c   :  { %v251_v21 = vld [vmem:[%s2290_s1 + $0x748] sm:$0xff]  ;;  %v250_v23 = vld [vmem:[%s2290_s1 + $0x740] sm:$0xff]  ;;  %557 = vmatpush2.msra.mxu1 %v254_v19  ;;  %487 = vmatprep.subr.mxu0 %v123_v20  ;;  %v77_v19 = vld [vmem:[%s2290_s1 + $0x1d8] sm:$0xff] }
  0x2d   :  { %v119_v24 = vld [vmem:[%s2290_s1 + $0x328] sm:$0xff]  ;;  %558 = vmatprep.subr.mxu1 %v251_v21  ;;  %v118_v26 = vld [vmem:[%s2290_s1 + $0x320] sm:$0xff]  ;;  %488 = vmatpush2.msra.mxu0 %v122_v22  ;;  %v76_v21 = vld [vmem:[%s2290_s1 + $0x1d0] sm:$0xff] }
  0x2e   :  { %v247_v25 = vld [vmem:[%s2290_s1 + $0x728] sm:$0xff]  ;;  %v246_v27 = vld [vmem:[%s2290_s1 + $0x720] sm:$0xff]  ;;  %559 = vmatpush2.msra.mxu1 %v250_v23  ;;  %489 = vmatprep.subr.mxu0 %v119_v24  ;;  %v73_v23 = vld [vmem:[%s2290_s1 + $0x1b8] sm:$0xff] }
  0x2f   :  { %v115_v28 = vld [vmem:[%s2290_s1 + $0x308] sm:$0xff]  ;;  %560 = vmatprep.subr.mxu1 %v247_v25  ;;  %v114_v30 = vld [vmem:[%s2290_s1 + $0x300] sm:$0xff]  ;;  %490 = vmatpush2.msra.mxu0 %v118_v26  ;;  %v72_v25 = vld [vmem:[%s2290_s1 + $0x1b0] sm:$0xff] }
  0x30   :  { %v243_v29 = vld [vmem:[%s2290_s1 + $0x708] sm:$0xff]  ;;  %v242_v31 = vld [vmem:[%s2290_s1 + $0x700] sm:$0xff]  ;;  %561 = vmatpush2.msra.mxu1 %v246_v27  ;;  %491 = vmatprep.subr.mxu0 %v115_v28  ;;  %v69_v27 = vld [vmem:[%s2290_s1 + $0x198] sm:$0xff] }
  0x31   :  { %v111_v32 = vld [vmem:[%s2290_s1 + $0x2e8] sm:$0xff]  ;;  %562 = vmatprep.subr.mxu1 %v243_v29  ;;  %v110_v34 = vld [vmem:[%s2290_s1 + $0x2e0] sm:$0xff]  ;;  %492 = vmatpush2.msra.mxu0 %v114_v30  ;;  %v68_v29 = vld [vmem:[%s2290_s1 + $0x190] sm:$0xff] }
  0x32   :  { %v239_v33 = vld [vmem:[%s2290_s1 + $0x6e8] sm:$0xff]  ;;  %v238_v35 = vld [vmem:[%s2290_s1 + $0x6e0] sm:$0xff]  ;;  %563 = vmatpush2.msra.mxu1 %v242_v31  ;;  %493 = vmatprep.subr.mxu0 %v111_v32  ;;  %v65_v31 = vld [vmem:[%s2290_s1 + $0x178] sm:$0xff] }
  0x33   :  { %v107_v36 = vld [vmem:[%s2290_s1 + $0x2c8] sm:$0xff]  ;;  %564 = vmatprep.subr.mxu1 %v239_v33  ;;  %v106_v38 = vld [vmem:[%s2290_s1 + $0x2c0] sm:$0xff]  ;;  %494 = vmatpush2.msra.mxu0 %v110_v34  ;;  %v64_v33 = vld [vmem:[%s2290_s1 + $0x170] sm:$0xff] }
  0x34   :  { %v235_v37 = vld [vmem:[%s2290_s1 + $0x6c8] sm:$0xff]  ;;  %v234_v39 = vld [vmem:[%s2290_s1 + $0x6c0] sm:$0xff]  ;;  %565 = vmatpush2.msra.mxu1 %v238_v35  ;;  %495 = vmatprep.subr.mxu0 %v107_v36  ;;  %v61_v35 = vld [vmem:[%s2290_s1 + $0x158] sm:$0xff] }
  0x35   :  { %v103_v40 = vld [vmem:[%s2290_s1 + $0x2a8] sm:$0xff]  ;;  %566 = vmatprep.subr.mxu1 %v235_v37  ;;  %v102_v42 = vld [vmem:[%s2290_s1 + $0x2a0] sm:$0xff]  ;;  %496 = vmatpush2.msra.mxu0 %v106_v38  ;;  %v60_v37 = vld [vmem:[%s2290_s1 + $0x150] sm:$0xff] }
  0x36   :  { %v231_v41 = vld [vmem:[%s2290_s1 + $0x6a8] sm:$0xff]  ;;  %v230_v43 = vld [vmem:[%s2290_s1 + $0x6a0] sm:$0xff]  ;;  %567 = vmatpush2.msra.mxu1 %v234_v39  ;;  %497 = vmatprep.subr.mxu0 %v103_v40  ;;  %v57_v39 = vld [vmem:[%s2290_s1 + $0x138] sm:$0xff] }
  0x37   :  { %v99_v44 = vld [vmem:[%s2290_s1 + $0x288] sm:$0xff]  ;;  %568 = vmatprep.subr.mxu1 %v231_v41  ;;  %v98_v46 = vld [vmem:[%s2290_s1 + $0x280] sm:$0xff]  ;;  %498 = vmatpush2.msra.mxu0 %v102_v42  ;;  %v56_v41 = vld [vmem:[%s2290_s1 + $0x130] sm:$0xff] }
  0x38   :  { %v227_v45 = vld [vmem:[%s2290_s1 + $0x688] sm:$0xff]  ;;  %v226_v47 = vld [vmem:[%s2290_s1 + $0x680] sm:$0xff]  ;;  %569 = vmatpush2.msra.mxu1 %v230_v43  ;;  %499 = vmatprep.subr.mxu0 %v99_v44  ;;  %v53_v43 = vld [vmem:[%s2290_s1 + $0x118] sm:$0xff] }
  0x39   :  { %v95_v48 = vld [vmem:[%s2290_s1 + $0x268] sm:$0xff]  ;;  %570 = vmatprep.subr.mxu1 %v227_v45  ;;  %v94_v50 = vld [vmem:[%s2290_s1 + $0x260] sm:$0xff]  ;;  %500 = vmatpush2.msra.mxu0 %v98_v46  ;;  %v52_v45 = vld [vmem:[%s2290_s1 + $0x110] sm:$0xff] }
  0x3a   :  { %v223_v49 = vld [vmem:[%s2290_s1 + $0x668] sm:$0xff]  ;;  %v222_v51 = vld [vmem:[%s2290_s1 + $0x660] sm:$0xff]  ;;  %571 = vmatpush2.msra.mxu1 %v226_v47  ;;  %501 = vmatprep.subr.mxu0 %v95_v48  ;;  %v49_v47 = vld [vmem:[%s2290_s1 + $0xf8] sm:$0xff] }
  0x3b   :  { %v91_v52 = vld [vmem:[%s2290_s1 + $0x248] sm:$0xff]  ;;  %572 = vmatprep.subr.mxu1 %v223_v49  ;;  %v90_v54 = vld [vmem:[%s2290_s1 + $0x240] sm:$0xff]  ;;  %502 = vmatpush2.msra.mxu0 %v94_v50  ;;  %v48_v49 = vld [vmem:[%s2290_s1 + $0xf0] sm:$0xff] }
  0x3c   :  { %v219_v53 = vld [vmem:[%s2290_s1 + $0x648] sm:$0xff]  ;;  %v218_v55 = vld [vmem:[%s2290_s1 + $0x640] sm:$0xff]  ;;  %573 = vmatpush2.msra.mxu1 %v222_v51  ;;  %503 = vmatprep.subr.mxu0 %v91_v52  ;;  %v45_v51 = vld [vmem:[%s2290_s1 + $0xd8] sm:$0xff] }
  0x3d   :  { %v1422_v56 = vld [vmem:[%s2291_s0] sm:$0xff]  ;;  %v87_v57 = vld [vmem:[%s2290_s1 + $0x228] sm:$0xff]  ;;  %574 = vmatprep.subr.mxu1 %v219_v53  ;;  %504 = vmatpush2.msra.mxu0 %v90_v54  ;;  %v44_v53 = vld [vmem:[%s2290_s1 + $0xd0] sm:$0xff] }
  0x3e   :  { %v215_v58 = vld [vmem:[%s2290_s1 + $0x628] sm:$0xff]  ;;  %v86_v60 = vld [vmem:[%s2290_s1 + $0x220] sm:$0xff]  ;;  %575 = vmatpush2.msra.mxu1 %v218_v55  ;;  %v1447_v0 = vcombine.high %v1422_v56, %v1422_v56  ;;  %505 = vmatprep.subr.mxu0 %v87_v57  ;;  %v41_v55 = vld [vmem:[%s2290_s1 + $0xb8] sm:$0xff] }
  0x3f   :  { %v15_v59 = vld [vmem:[%s2291_s0 + $0x8] sm:$0xff]  ;;  %v214_v61 = vld [vmem:[%s2290_s1 + $0x620] sm:$0xff]  ;;  %576 = vmatprep.subr.mxu1 %v215_v58  ;;  %506 = vmatpush2.msra.mxu0 %v86_v60  ;;  %v40_v58 = vld [vmem:[%s2290_s1 + $0xb0] sm:$0xff] }
  0x40   :  { %v83_v62 = vld [vmem:[%s2290_s1 + $0x208] sm:$0xff]  ;;  %v82_v1 = vld [vmem:[%s2290_s1 + $0x200] sm:$0xff]  ;;  %v1452_v2 = vcombine.high %v15_v59, %v15_v59  ;;  %577 = vmatpush2.msra.mxu1 %v214_v61  ;;  %509 = vmatprep.mubr.f32.mxu0 %v1447_v0  ;;  %v37_v60 = vld [vmem:[%s2290_s1 + $0x98] sm:$0xff] }
  0x41   :  { %v211_v63 = vld [vmem:[%s2290_s1 + $0x608] sm:$0xff]  ;;  %v210_v3 = vld [vmem:[%s2290_s1 + $0x600] sm:$0xff]  ;;  %507 = vmatprep.subr.mxu0 %v83_v62  ;;  %v36_v62 = vld [vmem:[%s2290_s1 + $0x90] sm:$0xff] }
  0x42   :  { %578 = vmatprep.subr.mxu1 %v211_v63  ;;  %508 = vmatpush2.msra.mxu0 %v82_v1  ;;  %v335_v4 = vld [vmem:[%s2290_s1 + $0x9e8] sm:$0xff]  ;;  %v334_v6 = vld [vmem:[%s2290_s1 + $0x9e0] sm:$0xff]  ;;  %v33_v1 = vld [vmem:[%s2290_s1 + $0x78] sm:$0xff] }
  0x43   :  { %v407_v5 = vld [vmem:[%s2290_s1 + $0xc28] sm:$0xff]  ;;  %579 = vmatpush2.msra.mxu1 %v210_v3  ;;  %580 = vmatprep.mubr.f32.mxu1 %v1452_v2  ;;  %v406_v7 = vld [vmem:[%s2290_s1 + $0xc20] sm:$0xff] }
  0x44   :  { %510 = vmatmul.mubr.f32.vlgmr.msra.gmra.mxu0 %v1422_v56  ;;  %581 = vmatmul.mubr.f32.vlgmr.msra.gmra.mxu1 %v15_v59  ;;  %v331_v8 = vld [vmem:[%s2290_s1 + $0x9c8] sm:$0xff]  ;;  %v330_v10 = vld [vmem:[%s2290_s1 + $0x9c0] sm:$0xff] }
  0x45   :  { %v403_v9 = vld [vmem:[%s2290_s1 + $0xc08] sm:$0xff]  ;;  %587 = vmatprep.subr.mxu0 %v335_v4  ;;  %686 = vmatprep.subr.mxu1 %v407_v5  ;;  %v402_v11 = vld [vmem:[%s2290_s1 + $0xc00] sm:$0xff]  ;;  %v32_v4 = vld [vmem:[%s2290_s1 + $0x70] sm:$0xff] }
  0x46   :  { %588 = vmatpush1.msra.mxu0 %v334_v6  ;;  %687 = vmatpush1.msra.mxu1 %v406_v7  ;;  %v327_v12 = vld [vmem:[%s2290_s1 + $0x9a8] sm:$0xff]  ;;  %v326_v15 = vld [vmem:[%s2290_s1 + $0x9a0] sm:$0xff]  ;;  %v29_v6 = vld [vmem:[%s2290_s1 + $0x58] sm:$0xff] }
  0x47   :  { %589 = vmatprep.subr.mxu0 %v331_v8  ;;  %688 = vmatprep.subr.mxu1 %v403_v9  ;;  %v323_v18 = vld [vmem:[%s2290_s1 + $0x988] sm:$0xff]  ;;  %v322_v20 = vld [vmem:[%s2290_s1 + $0x980] sm:$0xff]  ;;  %v28_v8 = vld [vmem:[%s2290_s1 + $0x50] sm:$0xff] }
  0x48   :  { %590 = vmatpush1.msra.mxu0 %v330_v10  ;;  %689 = vmatpush1.msra.mxu1 %v402_v11  ;;  %v319_v22 = vld [vmem:[%s2290_s1 + $0x968] sm:$0xff]  ;;  %v318_v24 = vld [vmem:[%s2290_s1 + $0x960] sm:$0xff]  ;;  %v25_v10 = vld [vmem:[%s2290_s1 + $0x38] sm:$0xff] }
  0x49   :  { %722 = vmatprep.mubr.f32.mxu1 %v1038_v17  ;;  %591 = vmatprep.subr.mxu0 %v327_v12  ;;  %v315_v26 = vld [vmem:[%s2290_s1 + $0x948] sm:$0xff]  ;;  %v314_v28 = vld [vmem:[%s2290_s1 + $0x940] sm:$0xff]  ;;  %v24_v12 = vld [vmem:[%s2290_s1 + $0x30] sm:$0xff] }
  0x4a   :  { %1030 = vmatmul.mubr.msk.f32.vlgmr.msra.gmra.mxu1 %vm442_vm0, %v17_v13  ;;  %729 = vmatprep.subr.mxu1 %v81_v14  ;;  %v311_v30 = vld [vmem:[%s2290_s1 + $0x928] sm:$0xff]  ;;  %v310_v32 = vld [vmem:[%s2290_s1 + $0x920] sm:$0xff]  ;;  %v21_v14 = vld [vmem:[%s2290_s1 + $0x18] sm:$0xff] }
  0x4b   :  { %592 = vmatpush1.msra.mxu0 %v326_v15  ;;  %730 = vmatpush1.msra.mxu1 %v80_v16  ;;  %v307_v34 = vld [vmem:[%s2290_s1 + $0x908] sm:$0xff]  ;;  %v306_v36 = vld [vmem:[%s2290_s1 + $0x900] sm:$0xff]  ;;  %v20_v16 = vld [vmem:[%s2290_s1 + $0x10] sm:$0xff] }
  0x4c   :  { %593 = vmatprep.subr.mxu0 %v323_v18  ;;  %731 = vmatprep.subr.mxu1 %v77_v19  ;;  %v303_v38 = vld [vmem:[%s2290_s1 + $0x8e8] sm:$0xff]  ;;  %v302_v40 = vld [vmem:[%s2290_s1 + $0x8e0] sm:$0xff]  ;;  %v145_v19 = vld [vmem:[%s2290_s1 + $0x3f8] sm:$0xff] }
  0x4d   :  { %594 = vmatpush1.msra.mxu0 %v322_v20  ;;  %732 = vmatpush1.msra.mxu1 %v76_v21  ;;  %v299_v42 = vld [vmem:[%s2290_s1 + $0x8c8] sm:$0xff]  ;;  %v298_v44 = vld [vmem:[%s2290_s1 + $0x8c0] sm:$0xff]  ;;  %v144_v21 = vld [vmem:[%s2290_s1 + $0x3f0] sm:$0xff] }
  0x4e   :  { %595 = vmatprep.subr.mxu0 %v319_v22  ;;  %733 = vmatprep.subr.mxu1 %v73_v23  ;;  %v295_v46 = vld [vmem:[%s2290_s1 + $0x8a8] sm:$0xff]  ;;  %v294_v48 = vld [vmem:[%s2290_s1 + $0x8a0] sm:$0xff]  ;;  %v141_v23 = vld [vmem:[%s2290_s1 + $0x3d8] sm:$0xff] }
  0x4f   :  { %596 = vmatpush1.msra.mxu0 %v318_v24  ;;  %734 = vmatpush1.msra.mxu1 %v72_v25  ;;  %v291_v50 = vld [vmem:[%s2290_s1 + $0x888] sm:$0xff]  ;;  %v290_v52 = vld [vmem:[%s2290_s1 + $0x880] sm:$0xff]  ;;  %v140_v25 = vld [vmem:[%s2290_s1 + $0x3d0] sm:$0xff] }
  0x50   :  { %597 = vmatprep.subr.mxu0 %v315_v26  ;;  %735 = vmatprep.subr.mxu1 %v69_v27  ;;  %v287_v54 = vld [vmem:[%s2290_s1 + $0x868] sm:$0xff]  ;;  %v286_v57 = vld [vmem:[%s2290_s1 + $0x860] sm:$0xff]  ;;  %v137_v27 = vld [vmem:[%s2290_s1 + $0x3b8] sm:$0xff] }
  0x51   :  { %598 = vmatpush1.msra.mxu0 %v314_v28  ;;  %736 = vmatpush1.msra.mxu1 %v68_v29  ;;  %v283_v59 = vld [vmem:[%s2290_s1 + $0x848] sm:$0xff]  ;;  %v282_v61 = vld [vmem:[%s2290_s1 + $0x840] sm:$0xff]  ;;  %v136_v29 = vld [vmem:[%s2290_s1 + $0x3b0] sm:$0xff] }
  0x52   :  { %599 = vmatprep.subr.mxu0 %v311_v30  ;;  %737 = vmatprep.subr.mxu1 %v65_v31  ;;  %v279_v63 = vld [vmem:[%s2290_s1 + $0x828] sm:$0xff]  ;;  %v278_v3 = vld [vmem:[%s2290_s1 + $0x820] sm:$0xff]  ;;  %v133_v31 = vld [vmem:[%s2290_s1 + $0x398] sm:$0xff] }
  0x53   :  { %600 = vmatpush1.msra.mxu0 %v310_v32  ;;  %738 = vmatpush1.msra.mxu1 %v64_v33  ;;  %v275_v5 = vld [vmem:[%s2290_s1 + $0x808] sm:$0xff]  ;;  %v274_v7 = vld [vmem:[%s2290_s1 + $0x800] sm:$0xff]  ;;  %v132_v33 = vld [vmem:[%s2290_s1 + $0x390] sm:$0xff] }
  0x54   :  { %601 = vmatprep.subr.mxu0 %v307_v34  ;;  %739 = vmatprep.subr.mxu1 %v61_v35  ;;  %v399_v9 = vld [vmem:[%s2290_s1 + $0xbe8] sm:$0xff]  ;;  %v398_v11 = vld [vmem:[%s2290_s1 + $0xbe0] sm:$0xff]  ;;  %v129_v35 = vld [vmem:[%s2290_s1 + $0x378] sm:$0xff] }
  0x55   :  { %602 = vmatpush1.msra.mxu0 %v306_v36  ;;  %740 = vmatpush1.msra.mxu1 %v60_v37  ;;  %v395_v13 = vld [vmem:[%s2290_s1 + $0xbc8] sm:$0xff]  ;;  %v394_v15 = vld [vmem:[%s2290_s1 + $0xbc0] sm:$0xff]  ;;  %v128_v37 = vld [vmem:[%s2290_s1 + $0x370] sm:$0xff] }
  0x56   :  { %603 = vmatprep.subr.mxu0 %v303_v38  ;;  %741 = vmatprep.subr.mxu1 %v57_v39  ;;  %v391_v18 = vld [vmem:[%s2290_s1 + $0xba8] sm:$0xff]  ;;  %v390_v20 = vld [vmem:[%s2290_s1 + $0xba0] sm:$0xff]  ;;  %v125_v39 = vld [vmem:[%s2290_s1 + $0x358] sm:$0xff] }
  0x57   :  { %604 = vmatpush1.msra.mxu0 %v302_v40  ;;  %742 = vmatpush1.msra.mxu1 %v56_v41  ;;  %v387_v22 = vld [vmem:[%s2290_s1 + $0xb88] sm:$0xff]  ;;  %v386_v24 = vld [vmem:[%s2290_s1 + $0xb80] sm:$0xff]  ;;  %v124_v41 = vld [vmem:[%s2290_s1 + $0x350] sm:$0xff] }
  0x58   :  { %605 = vmatprep.subr.mxu0 %v299_v42  ;;  %743 = vmatprep.subr.mxu1 %v53_v43  ;;  %v383_v26 = vld [vmem:[%s2290_s1 + $0xb68] sm:$0xff]  ;;  %v382_v28 = vld [vmem:[%s2290_s1 + $0xb60] sm:$0xff]  ;;  %v121_v43 = vld [vmem:[%s2290_s1 + $0x338] sm:$0xff] }
  0x59   :  { %606 = vmatpush1.msra.mxu0 %v298_v44  ;;  %744 = vmatpush1.msra.mxu1 %v52_v45  ;;  %v379_v30 = vld [vmem:[%s2290_s1 + $0xb48] sm:$0xff]  ;;  %v378_v32 = vld [vmem:[%s2290_s1 + $0xb40] sm:$0xff]  ;;  %v120_v45 = vld [vmem:[%s2290_s1 + $0x330] sm:$0xff] }
  0x5a   :  { %607 = vmatprep.subr.mxu0 %v295_v46  ;;  %745 = vmatprep.subr.mxu1 %v49_v47  ;;  %v375_v34 = vld [vmem:[%s2290_s1 + $0xb28] sm:$0xff]  ;;  %v374_v36 = vld [vmem:[%s2290_s1 + $0xb20] sm:$0xff]  ;;  %v117_v47 = vld [vmem:[%s2290_s1 + $0x318] sm:$0xff] }
  0x5b   :  { %608 = vmatpush1.msra.mxu0 %v294_v48  ;;  %746 = vmatpush1.msra.mxu1 %v48_v49  ;;  %v371_v38 = vld [vmem:[%s2290_s1 + $0xb08] sm:$0xff]  ;;  %v370_v40 = vld [vmem:[%s2290_s1 + $0xb00] sm:$0xff]  ;;  %v116_v49 = vld [vmem:[%s2290_s1 + $0x310] sm:$0xff] }
  0x5c   :  { %609 = vmatprep.subr.mxu0 %v291_v50  ;;  %747 = vmatprep.subr.mxu1 %v45_v51  ;;  %v367_v42 = vld [vmem:[%s2290_s1 + $0xae8] sm:$0xff]  ;;  %v366_v44 = vld [vmem:[%s2290_s1 + $0xae0] sm:$0xff]  ;;  %v113_v51 = vld [vmem:[%s2290_s1 + $0x2f8] sm:$0xff] }
  0x5d   :  { %610 = vmatpush1.msra.mxu0 %v290_v52  ;;  %748 = vmatpush1.msra.mxu1 %v44_v53  ;;  %v363_v46 = vld [vmem:[%s2290_s1 + $0xac8] sm:$0xff]  ;;  %v362_v48 = vld [vmem:[%s2290_s1 + $0xac0] sm:$0xff]  ;;  %v112_v53 = vld [vmem:[%s2290_s1 + $0x2f0] sm:$0xff] }
  0x5e   :  { %611 = vmatprep.subr.mxu0 %v287_v54  ;;  %749 = vmatprep.subr.mxu1 %v41_v55  ;;  %v359_v50 = vld [vmem:[%s2290_s1 + $0xaa8] sm:$0xff]  ;;  %v358_v52 = vld [vmem:[%s2290_s1 + $0xaa0] sm:$0xff]  ;;  %v109_v55 = vld [vmem:[%s2290_s1 + $0x2d8] sm:$0xff] }
  0x5f   :  { %612 = vmatpush1.msra.mxu0 %v286_v57  ;;  %750 = vmatpush1.msra.mxu1 %v40_v58  ;;  %v355_v54 = vld [vmem:[%s2290_s1 + $0xa88] sm:$0xff]  ;;  %v354_v57 = vld [vmem:[%s2290_s1 + $0xa80] sm:$0xff]  ;;  %v108_v58 = vld [vmem:[%s2290_s1 + $0x2d0] sm:$0xff] }
  0x60   :  { %613 = vmatprep.subr.mxu0 %v283_v59  ;;  %751 = vmatprep.subr.mxu1 %v37_v60  ;;  %v351_v59 = vld [vmem:[%s2290_s1 + $0xa68] sm:$0xff]  ;;  %v105_v60 = vld [vmem:[%s2290_s1 + $0x2b8] sm:$0xff] }
  0x61   :  { %614 = vmatpush1.msra.mxu0 %v282_v61  ;;  %752 = vmatpush1.msra.mxu1 %v36_v62  ;;  %v350_v61 = vld [vmem:[%s2290_s1 + $0xa60] sm:$0xff]  ;;  %v104_v62 = vld [vmem:[%s2290_s1 + $0x2b0] sm:$0xff] }
  0x62   :  { %615 = vmatprep.subr.mxu0 %v279_v63  ;;  %753 = vmatprep.subr.mxu1 %v33_v1  ;;  %v347_v63 = vld [vmem:[%s2290_s1 + $0xa48] sm:$0xff]  ;;  %v101_v1 = vld [vmem:[%s2290_s1 + $0x298] sm:$0xff] }
  0x63   :  { %616 = vmatpush1.msra.mxu0 %v278_v3  ;;  %754 = vmatpush1.msra.mxu1 %v32_v4  ;;  %v346_v3 = vld [vmem:[%s2290_s1 + $0xa40] sm:$0xff]  ;;  %v100_v4 = vld [vmem:[%s2290_s1 + $0x290] sm:$0xff] }
  0x64   :  { %617 = vmatprep.subr.mxu0 %v275_v5  ;;  %755 = vmatprep.subr.mxu1 %v29_v6  ;;  %v1828_v5 = vld [vmem:[%s2291_s0 + $0x10] sm:$0xff]  ;;  %v343_v6 = vld [vmem:[%s2290_s1 + $0xa28] sm:$0xff] }
  0x65   :  { %618 = vmatpush1.msra.mxu0 %v274_v7  ;;  %756 = vmatpush1.msra.mxu1 %v28_v8  ;;  %v97_v7 = vld [vmem:[%s2290_s1 + $0x278] sm:$0xff]  ;;  %v342_v8 = vld [vmem:[%s2290_s1 + $0xa20] sm:$0xff] }
  0x66   :  { %619 = vmatprep.subr.mxu0 %v399_v9  ;;  %757 = vmatprep.subr.mxu1 %v25_v10  ;;  %v96_v9 = vld [vmem:[%s2290_s1 + $0x270] sm:$0xff]  ;;  %v339_v10 = vld [vmem:[%s2290_s1 + $0xa08] sm:$0xff] }
  0x67   :  { %620 = vmatpush2.msra.mxu0 %v398_v11  ;;  %758 = vmatpush1.msra.mxu1 %v24_v12  ;;  %v93_v11 = vld [vmem:[%s2290_s1 + $0x258] sm:$0xff]  ;;  %v1850_v12 = vcombine.high %v1828_v5, %v1828_v5 }
  0x68   :  { %621 = vmatprep.subr.mxu0 %v395_v13  ;;  %759 = vmatprep.subr.mxu1 %v21_v14  ;;  %v338_v13 = vld [vmem:[%s2290_s1 + $0xa00] sm:$0xff]  ;;  %v92_v14 = vld [vmem:[%s2290_s1 + $0x250] sm:$0xff] }
  0x69   :  { %622 = vmatpush2.msra.mxu0 %v394_v15  ;;  %760 = vmatpush1.msra.mxu1 %v20_v16  ;;  %v89_v15 = vld [vmem:[%s2290_s1 + $0x238] sm:$0xff] }
  0x6a   :  { %623 = vmatprep.subr.mxu0 %v391_v18  ;;  %761 = vmatprep.subr.mxu1 %v145_v19  ;;  %v209_v16 = vld [vmem:[%s2290_s1 + $0x5f8] sm:$0xff]  ;;  %v88_v18 = vld [vmem:[%s2290_s1 + $0x230] sm:$0xff] }
  0x6b   :  { %624 = vmatpush2.msra.mxu0 %v390_v20  ;;  %762 = vmatpush2.msra.mxu1 %v144_v21  ;;  %v208_v19 = vld [vmem:[%s2290_s1 + $0x5f0] sm:$0xff]  ;;  %v85_v20 = vld [vmem:[%s2290_s1 + $0x218] sm:$0xff] }
  0x6c   :  { %625 = vmatprep.subr.mxu0 %v387_v22  ;;  %763 = vmatprep.subr.mxu1 %v141_v23  ;;  %v205_v21 = vld [vmem:[%s2290_s1 + $0x5d8] sm:$0xff]  ;;  %v84_v22 = vld [vmem:[%s2290_s1 + $0x210] sm:$0xff] }
  0x6d   :  { %626 = vmatpush2.msra.mxu0 %v386_v24  ;;  %764 = vmatpush2.msra.mxu1 %v140_v25  ;;  %v204_v23 = vld [vmem:[%s2290_s1 + $0x5d0] sm:$0xff]  ;;  %v201_v24 = vld [vmem:[%s2290_s1 + $0x5b8] sm:$0xff] }
  0x6e   :  { %627 = vmatprep.subr.mxu0 %v383_v26  ;;  %765 = vmatprep.subr.mxu1 %v137_v27  ;;  %v337_v25 = vld [vmem:[%s2290_s1 + $0x9f8] sm:$0xff]  ;;  %v200_v26 = vld [vmem:[%s2290_s1 + $0x5b0] sm:$0xff] }
  0x6f   :  { %628 = vmatpush2.msra.mxu0 %v382_v28  ;;  %766 = vmatpush2.msra.mxu1 %v136_v29  ;;  %v336_v27 = vld [vmem:[%s2290_s1 + $0x9f0] sm:$0xff]  ;;  %v197_v28 = vld [vmem:[%s2290_s1 + $0x598] sm:$0xff] }
  0x70   :  { %629 = vmatprep.subr.mxu0 %v379_v30  ;;  %767 = vmatprep.subr.mxu1 %v133_v31  ;;  %v333_v29 = vld [vmem:[%s2290_s1 + $0x9d8] sm:$0xff]  ;;  %v332_v30 = vld [vmem:[%s2290_s1 + $0x9d0] sm:$0xff] }
  0x71   :  { %630 = vmatpush2.msra.mxu0 %v378_v32  ;;  %768 = vmatpush2.msra.mxu1 %v132_v33  ;;  %v329_v31 = vld [vmem:[%s2290_s1 + $0x9b8] sm:$0xff]  ;;  %v192_v32 = vld [vmem:[%s2290_s1 + $0x570] sm:$0xff] }
  0x72   :  { %631 = vmatprep.subr.mxu0 %v375_v34  ;;  %769 = vmatprep.subr.mxu1 %v129_v35  ;;  %v328_v33 = vld [vmem:[%s2290_s1 + $0x9b0] sm:$0xff]  ;;  %v189_v34 = vld [vmem:[%s2290_s1 + $0x558] sm:$0xff] }
  0x73   :  { %632 = vmatpush2.msra.mxu0 %v374_v36  ;;  %770 = vmatpush2.msra.mxu1 %v128_v37  ;;  %v325_v35 = vld [vmem:[%s2290_s1 + $0x998] sm:$0xff]  ;;  %v188_v36 = vld [vmem:[%s2290_s1 + $0x550] sm:$0xff] }
  0x74   :  { %633 = vmatprep.subr.mxu0 %v371_v38  ;;  %771 = vmatprep.subr.mxu1 %v125_v39  ;;  %v324_v37 = vld [vmem:[%s2290_s1 + $0x990] sm:$0xff]  ;;  %v185_v38 = vld [vmem:[%s2290_s1 + $0x538] sm:$0xff] }
  0x75   :  { %634 = vmatpush2.msra.mxu0 %v370_v40  ;;  %772 = vmatpush2.msra.mxu1 %v124_v41  ;;  %v321_v39 = vld [vmem:[%s2290_s1 + $0x978] sm:$0xff]  ;;  %v184_v40 = vld [vmem:[%s2290_s1 + $0x530] sm:$0xff] }
  0x76   :  { %635 = vmatprep.subr.mxu0 %v367_v42  ;;  %773 = vmatprep.subr.mxu1 %v121_v43  ;;  %v320_v41 = vld [vmem:[%s2290_s1 + $0x970] sm:$0xff]  ;;  %v181_v42 = vld [vmem:[%s2290_s1 + $0x518] sm:$0xff] }
  0x77   :  { %636 = vmatpush2.msra.mxu0 %v366_v44  ;;  %774 = vmatpush2.msra.mxu1 %v120_v45  ;;  %v317_v43 = vld [vmem:[%s2290_s1 + $0x958] sm:$0xff]  ;;  %v180_v44 = vld [vmem:[%s2290_s1 + $0x510] sm:$0xff] }
  0x78   :  { %637 = vmatprep.subr.mxu0 %v363_v46  ;;  %775 = vmatprep.subr.mxu1 %v117_v47  ;;  %v316_v45 = vld [vmem:[%s2290_s1 + $0x950] sm:$0xff]  ;;  %v177_v46 = vld [vmem:[%s2290_s1 + $0x4f8] sm:$0xff] }
  0x79   :  { %638 = vmatpush2.msra.mxu0 %v362_v48  ;;  %776 = vmatpush2.msra.mxu1 %v116_v49  ;;  %v313_v47 = vld [vmem:[%s2290_s1 + $0x938] sm:$0xff]  ;;  %v176_v48 = vld [vmem:[%s2290_s1 + $0x4f0] sm:$0xff] }
  0x7a   :  { %639 = vmatprep.subr.mxu0 %v359_v50  ;;  %777 = vmatprep.subr.mxu1 %v113_v51  ;;  %v312_v49 = vld [vmem:[%s2290_s1 + $0x930] sm:$0xff]  ;;  %v173_v50 = vld [vmem:[%s2290_s1 + $0x4d8] sm:$0xff] }
  0x7b   :  { %640 = vmatpush2.msra.mxu0 %v358_v52  ;;  %778 = vmatpush2.msra.mxu1 %v112_v53  ;;  %v309_v51 = vld [vmem:[%s2290_s1 + $0x918] sm:$0xff]  ;;  %v172_v52 = vld [vmem:[%s2290_s1 + $0x4d0] sm:$0xff] }
  0x7c   :  { %641 = vmatprep.subr.mxu0 %v355_v54  ;;  %779 = vmatprep.subr.mxu1 %v109_v55  ;;  %v308_v53 = vld [vmem:[%s2290_s1 + $0x910] sm:$0xff]  ;;  %v169_v54 = vld [vmem:[%s2290_s1 + $0x4b8] sm:$0xff] }
  0x7d   :  { %642 = vmatpush2.msra.mxu0 %v354_v57  ;;  %780 = vmatpush2.msra.mxu1 %v108_v58  ;;  %v305_v55 = vld [vmem:[%s2290_s1 + $0x8f8] sm:$0xff]  ;;  %v168_v57 = vld [vmem:[%s2290_s1 + $0x4b0] sm:$0xff] }
  0x7e   :  { %643 = vmatprep.subr.mxu0 %v351_v59  ;;  %781 = vmatprep.subr.mxu1 %v105_v60  ;;  %v304_v58 = vld [vmem:[%s2290_s1 + $0x8f0] sm:$0xff]  ;;  %v165_v59 = vld [vmem:[%s2290_s1 + $0x498] sm:$0xff] }
  0x7f   :  { %644 = vmatpush2.msra.mxu0 %v350_v61  ;;  %782 = vmatpush2.msra.mxu1 %v104_v62  ;;  %v301_v60 = vld [vmem:[%s2290_s1 + $0x8d8] sm:$0xff]  ;;  %v164_v61 = vld [vmem:[%s2290_s1 + $0x490] sm:$0xff] }
  0x80   :  { %645 = vmatprep.subr.mxu0 %v347_v63  ;;  %783 = vmatprep.subr.mxu1 %v101_v1  ;;  %v300_v62 = vld [vmem:[%s2290_s1 + $0x8d0] sm:$0xff]  ;;  %v161_v63 = vld [vmem:[%s2290_s1 + $0x478] sm:$0xff] }
  0x81   :  { %646 = vmatpush2.msra.mxu0 %v346_v3  ;;  %784 = vmatpush2.msra.mxu1 %v100_v4  ;;  %v297_v1 = vld [vmem:[%s2290_s1 + $0x8b8] sm:$0xff]  ;;  %v160_v3 = vld [vmem:[%s2290_s1 + $0x470] sm:$0xff] }
  0x82   :  { %647 = vmatprep.subr.mxu0 %v343_v6  ;;  %785 = vmatprep.subr.mxu1 %v97_v7  ;;  %v296_v4 = vld [vmem:[%s2290_s1 + $0x8b0] sm:$0xff]  ;;  %v157_v6 = vld [vmem:[%s2290_s1 + $0x458] sm:$0xff] }
  0x83   :  { %648 = vmatpush2.msra.mxu0 %v342_v8  ;;  %786 = vmatpush2.msra.mxu1 %v96_v9  ;;  %v293_v7 = vld [vmem:[%s2290_s1 + $0x898] sm:$0xff]  ;;  %v156_v8 = vld [vmem:[%s2290_s1 + $0x450] sm:$0xff] }
  0x84   :  { %649 = vmatprep.subr.mxu0 %v339_v10  ;;  %787 = vmatprep.subr.mxu1 %v93_v11  ;;  %v292_v9 = vld [vmem:[%s2290_s1 + $0x890] sm:$0xff]  ;;  %v153_v10 = vld [vmem:[%s2290_s1 + $0x438] sm:$0xff] }
  0x85   :  { %650 = vmatpush2.msra.mxu0 %v338_v13  ;;  %651 = vmatprep.mubr.f32.mxu0 %v1850_v12  ;;  %v289_v11 = vld [vmem:[%s2290_s1 + $0x878] sm:$0xff]  ;;  %v152_v13 = vld [vmem:[%s2290_s1 + $0x430] sm:$0xff] }
  0x86   :  { %788 = vmatpush2.msra.mxu1 %v92_v14  ;;  %652 = vmatmul.mubr.f32.vlgmr.msra.gmra.mxu0 %v1828_v5  ;;  %v288_v14 = vld [vmem:[%s2290_s1 + $0x870] sm:$0xff] }
  0x87   :  { %789 = vmatprep.subr.mxu1 %v89_v15  ;;  %800 = vmatprep.subr.mxu0 %v209_v16  ;;  %v149_v15 = vld [vmem:[%s2290_s1 + $0x418] sm:$0xff] }
  0x88   :  { %790 = vmatpush2.msra.mxu1 %v88_v18  ;;  %801 = vmatpush1.msra.mxu0 %v208_v19  ;;  %v285_v16 = vld [vmem:[%s2290_s1 + $0x858] sm:$0xff]  ;;  %v148_v18 = vld [vmem:[%s2290_s1 + $0x410] sm:$0xff] }
  0x89   :  { %791 = vmatprep.subr.mxu1 %v85_v20  ;;  %802 = vmatprep.subr.mxu0 %v205_v21  ;;  %v284_v19 = vld [vmem:[%s2290_s1 + $0x850] sm:$0xff]  ;;  %v273_v20 = vld [vmem:[%s2290_s1 + $0x7f8] sm:$0xff] }
  0x8a   :  { %792 = vmatpush2.msra.mxu1 %v84_v22  ;;  %793 = vmatprep.mubr.f32.mxu1 %v1447_v0  ;;  %v196_v0 = vld [vmem:[%s2290_s1 + $0x590] sm:$0xff]  ;;  %v281_v21 = vld [vmem:[%s2290_s1 + $0x838] sm:$0xff] }
  0x8b   :  { %803 = vmatpush1.msra.mxu0 %v204_v23  ;;  %794 = vmatmul.mubr.f32.vlgmr.msra.gmra.mxu1 %v1422_v56  ;;  %v193_v56 = vld [vmem:[%s2290_s1 + $0x578] sm:$0xff]  ;;  %v272_v22 = vld [vmem:[%s2290_s1 + $0x7f0] sm:$0xff] }
  0x8c   :  { %804 = vmatprep.subr.mxu0 %v201_v24  ;;  %871 = vmatprep.subr.mxu1 %v337_v25  ;;  %v280_v23 = vld [vmem:[%s2290_s1 + $0x830] sm:$0xff]  ;;  %v269_v24 = vld [vmem:[%s2290_s1 + $0x7d8] sm:$0xff] }
  0x8d   :  { %805 = vmatpush1.msra.mxu0 %v200_v26  ;;  %872 = vmatpush1.msra.mxu1 %v336_v27  ;;  %v277_v25 = vld [vmem:[%s2290_s1 + $0x818] sm:$0xff]  ;;  %v268_v26 = vld [vmem:[%s2290_s1 + $0x7d0] sm:$0xff] }
  0x8e   :  { %806 = vmatprep.subr.mxu0 %v197_v28  ;;  %873 = vmatprep.subr.mxu1 %v333_v29  ;;  %v276_v27 = vld [vmem:[%s2290_s1 + $0x810] sm:$0xff]  ;;  %v265_v28 = vld [vmem:[%s2290_s1 + $0x7b8] sm:$0xff] }
  0x8f   :  { %807 = vmatpush1.msra.mxu0 %v196_v0  ;;  %874 = vmatpush1.msra.mxu1 %v332_v30  ;;  %v401_v29 = vld [vmem:[%s2290_s1 + $0xbf8] sm:$0xff]  ;;  %v264_v0 = vld [vmem:[%s2290_s1 + $0x7b0] sm:$0xff] }
  0x90   :  { %808 = vmatprep.subr.mxu0 %v193_v56  ;;  %875 = vmatprep.subr.mxu1 %v329_v31  ;;  %v400_v30 = vld [vmem:[%s2290_s1 + $0xbf0] sm:$0xff]  ;;  %v261_v56 = vld [vmem:[%s2290_s1 + $0x798] sm:$0xff] }
  0x91   :  { %809 = vmatpush1.msra.mxu0 %v192_v32  ;;  %876 = vmatpush1.msra.mxu1 %v328_v33  ;;  %v397_v31 = vld [vmem:[%s2290_s1 + $0xbd8] sm:$0xff]  ;;  %v260_v32 = vld [vmem:[%s2290_s1 + $0x790] sm:$0xff] }
  0x92   :  { %810 = vmatprep.subr.mxu0 %v189_v34  ;;  %877 = vmatprep.subr.mxu1 %v325_v35  ;;  %v396_v33 = vld [vmem:[%s2290_s1 + $0xbd0] sm:$0xff]  ;;  %v257_v34 = vld [vmem:[%s2290_s1 + $0x778] sm:$0xff] }
  0x93   :  { %811 = vmatpush1.msra.mxu0 %v188_v36  ;;  %878 = vmatpush1.msra.mxu1 %v324_v37  ;;  %v393_v35 = vld [vmem:[%s2290_s1 + $0xbb8] sm:$0xff]  ;;  %v256_v36 = vld [vmem:[%s2290_s1 + $0x770] sm:$0xff] }
  0x94   :  { %812 = vmatprep.subr.mxu0 %v185_v38  ;;  %879 = vmatprep.subr.mxu1 %v321_v39  ;;  %v392_v37 = vld [vmem:[%s2290_s1 + $0xbb0] sm:$0xff]  ;;  %v253_v38 = vld [vmem:[%s2290_s1 + $0x758] sm:$0xff] }
  0x95   :  { %813 = vmatpush1.msra.mxu0 %v184_v40  ;;  %880 = vmatpush1.msra.mxu1 %v320_v41  ;;  %v389_v39 = vld [vmem:[%s2290_s1 + $0xb98] sm:$0xff]  ;;  %v252_v40 = vld [vmem:[%s2290_s1 + $0x750] sm:$0xff] }
  0x96   :  { %814 = vmatprep.subr.mxu0 %v181_v42  ;;  %881 = vmatprep.subr.mxu1 %v317_v43  ;;  %v388_v41 = vld [vmem:[%s2290_s1 + $0xb90] sm:$0xff]  ;;  %v249_v42 = vld [vmem:[%s2290_s1 + $0x738] sm:$0xff] }
  0x97   :  { %815 = vmatpush1.msra.mxu0 %v180_v44  ;;  %882 = vmatpush1.msra.mxu1 %v316_v45  ;;  %v385_v43 = vld [vmem:[%s2290_s1 + $0xb78] sm:$0xff]  ;;  %v248_v44 = vld [vmem:[%s2290_s1 + $0x730] sm:$0xff] }
  0x98   :  { %816 = vmatprep.subr.mxu0 %v177_v46  ;;  %883 = vmatprep.subr.mxu1 %v313_v47  ;;  %v384_v45 = vld [vmem:[%s2290_s1 + $0xb70] sm:$0xff]  ;;  %v245_v46 = vld [vmem:[%s2290_s1 + $0x718] sm:$0xff] }
  0x99   :  { %817 = vmatpush1.msra.mxu0 %v176_v48  ;;  %884 = vmatpush1.msra.mxu1 %v312_v49  ;;  %v381_v47 = vld [vmem:[%s2290_s1 + $0xb58] sm:$0xff]  ;;  %v244_v48 = vld [vmem:[%s2290_s1 + $0x710] sm:$0xff] }
  0x9a   :  { %818 = vmatprep.subr.mxu0 %v173_v50  ;;  %885 = vmatprep.subr.mxu1 %v309_v51  ;;  %v380_v49 = vld [vmem:[%s2290_s1 + $0xb50] sm:$0xff]  ;;  %v241_v50 = vld [vmem:[%s2290_s1 + $0x6f8] sm:$0xff] }
  0x9b   :  { %819 = vmatpush1.msra.mxu0 %v172_v52  ;;  %886 = vmatpush1.msra.mxu1 %v308_v53  ;;  %v377_v51 = vld [vmem:[%s2290_s1 + $0xb38] sm:$0xff]  ;;  %v240_v52 = vld [vmem:[%s2290_s1 + $0x6f0] sm:$0xff] }
  0x9c   :  { %820 = vmatprep.subr.mxu0 %v169_v54  ;;  %887 = vmatprep.subr.mxu1 %v305_v55  ;;  %v376_v53 = vld [vmem:[%s2290_s1 + $0xb30] sm:$0xff]  ;;  %v237_v54 = vld [vmem:[%s2290_s1 + $0x6d8] sm:$0xff] }
  0x9d   :  { %821 = vmatpush1.msra.mxu0 %v168_v57  ;;  %888 = vmatpush1.msra.mxu1 %v304_v58  ;;  %v373_v55 = vld [vmem:[%s2290_s1 + $0xb18] sm:$0xff]  ;;  %v236_v57 = vld [vmem:[%s2290_s1 + $0x6d0] sm:$0xff] }
  0x9e   :  { %822 = vmatprep.subr.mxu0 %v165_v59  ;;  %889 = vmatprep.subr.mxu1 %v301_v60  ;;  %v372_v58 = vld [vmem:[%s2290_s1 + $0xb10] sm:$0xff]  ;;  %v233_v59 = vld [vmem:[%s2290_s1 + $0x6b8] sm:$0xff] }
  0x9f   :  { %823 = vmatpush1.msra.mxu0 %v164_v61  ;;  %890 = vmatpush1.msra.mxu1 %v300_v62  ;;  %v369_v60 = vld [vmem:[%s2290_s1 + $0xaf8] sm:$0xff]  ;;  %v232_v61 = vld [vmem:[%s2290_s1 + $0x6b0] sm:$0xff] }
  0xa0   :  { %824 = vmatprep.subr.mxu0 %v161_v63  ;;  %891 = vmatprep.subr.mxu1 %v297_v1  ;;  %v368_v62 = vld [vmem:[%s2290_s1 + $0xaf0] sm:$0xff]  ;;  %v229_v63 = vld [vmem:[%s2290_s1 + $0x698] sm:$0xff] }
  0xa1   :  { %825 = vmatpush1.msra.mxu0 %v160_v3  ;;  %892 = vmatpush1.msra.mxu1 %v296_v4  ;;  %v365_v1 = vld [vmem:[%s2290_s1 + $0xad8] sm:$0xff]  ;;  %v228_v3 = vld [vmem:[%s2290_s1 + $0x690] sm:$0xff] }
  0xa2   :  { %826 = vmatprep.subr.mxu0 %v157_v6  ;;  %893 = vmatprep.subr.mxu1 %v293_v7  ;;  %v364_v4 = vld [vmem:[%s2290_s1 + $0xad0] sm:$0xff]  ;;  %v225_v6 = vld [vmem:[%s2290_s1 + $0x678] sm:$0xff] }
  0xa3   :  { %827 = vmatpush1.msra.mxu0 %v156_v8  ;;  %894 = vmatpush1.msra.mxu1 %v292_v9  ;;  %v361_v7 = vld [vmem:[%s2290_s1 + $0xab8] sm:$0xff]  ;;  %v224_v8 = vld [vmem:[%s2290_s1 + $0x670] sm:$0xff] }
  0xa4   :  { %828 = vmatprep.subr.mxu0 %v153_v10  ;;  %895 = vmatprep.subr.mxu1 %v289_v11  ;;  %v360_v9 = vld [vmem:[%s2290_s1 + $0xab0] sm:$0xff]  ;;  %v221_v10 = vld [vmem:[%s2290_s1 + $0x658] sm:$0xff] }
  0xa5   :  { %829 = vmatpush1.msra.mxu0 %v152_v13  ;;  %896 = vmatpush1.msra.mxu1 %v288_v14  ;;  %v357_v11 = vld [vmem:[%s2290_s1 + $0xa98] sm:$0xff]  ;;  %v220_v13 = vld [vmem:[%s2290_s1 + $0x650] sm:$0xff] }
  0xa6   :  { %830 = vmatprep.subr.mxu0 %v149_v15  ;;  %897 = vmatprep.subr.mxu1 %v285_v16  ;;  %v356_v14 = vld [vmem:[%s2290_s1 + $0xa90] sm:$0xff]  ;;  %v217_v15 = vld [vmem:[%s2290_s1 + $0x638] sm:$0xff] }
  0xa7   :  { %831 = vmatpush1.msra.mxu0 %v148_v18  ;;  %898 = vmatpush1.msra.mxu1 %v284_v19  ;;  %v353_v16 = vld [vmem:[%s2290_s1 + $0xa78] sm:$0xff]  ;;  %v216_v18 = vld [vmem:[%s2290_s1 + $0x630] sm:$0xff] }
  0xa8   :  { %832 = vmatprep.subr.mxu0 %v273_v20  ;;  %899 = vmatprep.subr.mxu1 %v281_v21  ;;  %v352_v19 = vld [vmem:[%s2290_s1 + $0xa70] sm:$0xff]  ;;  %v213_v20 = vld [vmem:[%s2290_s1 + $0x618] sm:$0xff] }
  0xa9   :  { %833 = vmatpush2.msra.mxu0 %v272_v22  ;;  %900 = vmatpush1.msra.mxu1 %v280_v23  ;;  %v349_v21 = vld [vmem:[%s2290_s1 + $0xa58] sm:$0xff]  ;;  %v212_v22 = vld [vmem:[%s2290_s1 + $0x610] sm:$0xff] }
  0xaa   :  { %834 = vmatprep.subr.mxu0 %v269_v24  ;;  %901 = vmatprep.subr.mxu1 %v277_v25  ;;  %v348_v23 = vld [vmem:[%s2290_s1 + $0xa50] sm:$0xff]  ;;  %v345_v24 = vld [vmem:[%s2290_s1 + $0xa38] sm:$0xff] }
  0xab   :  { %835 = vmatpush2.msra.mxu0 %v268_v26  ;;  %902 = vmatpush1.msra.mxu1 %v276_v27  ;;  %v409_v25 = vld [vmem:[%s2290_s1 + $0xc38] sm:$0xff]  ;;  %v344_v26 = vld [vmem:[%s2290_s1 + $0xa30] sm:$0xff] }
  0xac   :  { %836 = vmatprep.subr.mxu0 %v265_v28  ;;  %903 = vmatprep.subr.mxu1 %v401_v29  ;;  %v408_v27 = vld [vmem:[%s2290_s1 + $0xc30] sm:$0xff]  ;;  %v1036_v28 = vld [vmem:[%s2291_s0 + $0x8] sm:$0xff]  ;;  %v341_v29 = vld [vmem:[%s2290_s1 + $0xa18] sm:$0xff] }
  0xad   :  { %837 = vmatpush2.msra.mxu0 %v264_v0  ;;  %904 = vmatpush2.msra.mxu1 %v400_v30  ;;  %v340_v0 = vld [vmem:[%s2290_s1 + $0xa10] sm:$0xff] }
  0xae   :  { %838 = vmatprep.subr.mxu0 %v261_v56  ;;  %905 = vmatprep.subr.mxu1 %v397_v31  ;;  %v404_v30 = vld [vmem:[%s2290_s1 + $0xc10] sm:$0xff]  ;;  %v1037_v56 = vld [vmem:[%s2291_s0 + $0x18] sm:$0xf]  ;;  %v412_v31 = vlaneseq }
  0xaf   :  { %839 = vmatpush2.msra.mxu0 %v260_v32  ;;  %906 = vmatpush2.msra.mxu1 %v396_v33 }
  0xb0   :  { %840 = vmatprep.subr.mxu0 %v257_v34  ;;  %907 = vmatprep.subr.mxu1 %v393_v35  ;;  %v413_v32 = vshrl.u32 %v412_v31, 7  ;;  %v410_v34 = vld [vmem:[%s2292_s2] sm:$0xf] }
  0xb1   :  { %841 = vmatpush2.msra.mxu0 %v256_v36  ;;  %908 = vmatpush2.msra.mxu1 %v392_v37 }
  0xb2   :  { %842 = vmatprep.subr.mxu0 %v253_v38  ;;  %909 = vmatprep.subr.mxu1 %v389_v39  ;;  %v414_v33 = vsub.s32 0, %v413_v32  ;;  %v418_v35 = vsub.s32 1, %v413_v32 }
  0xb3   :  { %843 = vmatpush2.msra.mxu0 %v252_v40  ;;  %910 = vmatpush2.msra.mxu1 %v388_v41 }
  0xb4   :  { %844 = vmatprep.subr.mxu0 %v249_v42  ;;  %911 = vmatprep.subr.mxu1 %v385_v43  ;;  %v415_v36 = vrot.slane %v410_v34, %v414_v33 }
  0xb5   :  { %845 = vmatpush2.msra.mxu0 %v248_v44  ;;  %912 = vmatpush2.msra.mxu1 %v384_v45 }
  0xb6   :  { %846 = vmatprep.subr.mxu0 %v245_v46  ;;  %913 = vmatprep.subr.mxu1 %v381_v47 }
  0xb7   :  { %847 = vmatpush2.msra.mxu0 %v244_v48  ;;  %914 = vmatpush2.msra.mxu1 %v380_v49 }
  0xb8   :  { %848 = vmatprep.subr.mxu0 %v241_v50  ;;  %915 = vmatprep.subr.mxu1 %v377_v51 }
  0xb9   :  { %849 = vmatpush2.msra.mxu0 %v240_v52  ;;  %916 = vmatpush2.msra.mxu1 %v376_v53  ;;  %v422_v52 = vsub.s32 2, %v413_v32  ;;  %v426_v53 = vsub.s32 3, %v413_v32 }
  0xba   :  { %850 = vmatprep.subr.mxu0 %v237_v54  ;;  %917 = vmatprep.subr.mxu1 %v373_v55 }
  0xbb   :  { %851 = vmatpush2.msra.mxu0 %v236_v57  ;;  %918 = vmatpush2.msra.mxu1 %v372_v58  ;;  %v423_v55 = vrot.slane %v410_v34, %v422_v52  ;;  %v427_v58 = vrot.slane %v410_v34, %v426_v53 }
  0xbc   :  { %852 = vmatprep.subr.mxu0 %v233_v59  ;;  %919 = vmatprep.subr.mxu1 %v369_v60 }
  0xbd   :  { %853 = vmatpush2.msra.mxu0 %v232_v61  ;;  %920 = vmatpush2.msra.mxu1 %v368_v62 }
  0xbe   :  { %854 = vmatprep.subr.mxu0 %v229_v63  ;;  %921 = vmatprep.subr.mxu1 %v365_v1 }
  0xbf   :  { %855 = vmatpush2.msra.mxu0 %v228_v3  ;;  %922 = vmatpush2.msra.mxu1 %v364_v4 }
  0xc0   :  { %856 = vmatprep.subr.mxu0 %v225_v6  ;;  %923 = vmatprep.subr.mxu1 %v361_v7 }
  0xc1   :  { %857 = vmatpush2.msra.mxu0 %v224_v8  ;;  %924 = vmatpush2.msra.mxu1 %v360_v9 }
  0xc2   :  { %858 = vmatprep.subr.mxu0 %v221_v10  ;;  %925 = vmatprep.subr.mxu1 %v357_v11 }
  0xc3   :  { %859 = vmatpush2.msra.mxu0 %v220_v13  ;;  %926 = vmatpush2.msra.mxu1 %v356_v14 }
  0xc4   :  { %860 = vmatprep.subr.mxu0 %v217_v15  ;;  %927 = vmatprep.subr.mxu1 %v353_v16 }
  0xc5   :  { %861 = vmatpush2.msra.mxu0 %v216_v18  ;;  %928 = vmatpush2.msra.mxu1 %v352_v19 }
  0xc6   :  { %862 = vmatprep.subr.mxu0 %v213_v20  ;;  %929 = vmatprep.subr.mxu1 %v349_v21 }
  0xc7   :  { %863 = vmatpush2.msra.mxu0 %v212_v22  ;;  %864 = vmatprep.mubr.f32.mxu0 %v1452_v2  ;;  %v405_v2 = vld [vmem:[%s2290_s1 + $0xc18] sm:$0xff] }
  0xc8   :  { %930 = vmatpush2.msra.mxu1 %v348_v23  ;;  %865 = vmatmul.mubr.f32.vlgmr.msra.gmra.mxu0 %v1036_v28 }
  0xc9   :  { %931 = vmatprep.subr.mxu1 %v345_v24  ;;  %970 = vmatprep.subr.mxu0 %v409_v25 }
  0xca   :  { %932 = vmatpush2.msra.mxu1 %v344_v26  ;;  %971 = vmatpush1.msra.mxu0 %v408_v27 }
  0xcb   :  { %933 = vmatprep.subr.mxu1 %v341_v29  ;;  %972 = vmatprep.subr.mxu0 %v405_v2 }
  0xcc   :  { %934 = vmatpush2.msra.mxu1 %v340_v0  ;;  %935 = vmatprep.mubr.f32.mxu1 %v1850_v12 }
  0xcd   :  { %973 = vmatpush1.msra.mxu0 %v404_v30  ;;  %1006 = vmatprep.mubr.f32.mxu0 %v1038_v17  ;;  %v419_v17 = vrot.slane %v410_v34, %v418_v35 }
  0xce   :  { %936 = vmatmul.mubr.f32.vlgmr.msra.gmra.mxu1 %v1828_v5  ;;  %1031 = vmatmul.mubr.msk.f32.vlgmr.msra.gmra.mxu0 %vm442_vm0, %v1037_v56 }
 0x104   :  { %v511_v12 = vpop.f32.mrf.mxu0  ;;  %v582_v37 = vpop.f32.mrf.mxu1 }
 0x105   :  { %v512_v5 = vadd.f32 %v511_v12, %v415_v36 }
 0x106   :  { %v513_v38 = vpop.f32.mrf.mxu0  ;;  %v584_v39 = vpop.f32.mrf.mxu1 }
 0x107   :  { %v514_v40 = vadd.f32 %v513_v38, %v419_v17  ;;  %v583_v41 = vadd.f32 %v582_v37, %v512_v5 }
 0x109   :  { %v585_v44 = vadd.f32 %v584_v39, %v514_v40 }
 0x10a   :  { %v724_v42 = vpop.f32.mrf.mxu1 }
 0x10c   :  { %v726_v48 = vpop.f32.mrf.mxu1 }
 0x146   :  { %v653_v43 = vpop.f32.mrf.mxu0 }
 0x147   :  { %v654_v45 = vadd.f32 %v653_v43, %v583_v41 }
 0x148   :  { %v655_v46 = vpop.f32.mrf.mxu0 }
 0x149   :  { %v656_v47 = vadd.f32 %v655_v46, %v585_v44  ;;  %v725_v49 = vadd.f32 %v724_v42, %v654_v45 }
 0x14b   :  { %v727_v50 = vadd.f32 %v726_v48, %v656_v47  ;;  %v795_v54 = vpop.f32.mrf.mxu1 }
 0x14c   :  { %v796_v61 = vadd.f32 %v795_v54, %v423_v55 }
 0x14d   :  { %v1017_v51 = vcombine.low %v725_v49, %v727_v50  ;;  %v797_v59 = vpop.f32.mrf.mxu1 }
 0x14e   :  { %v798_v62 = vadd.f32 %v797_v59, %v427_v58 }
 0x14f   :  { %1021 = vst [vmem:[%s2293_s3] sm:$0xff] %v1017_v51 }
 0x188   :  { %v866_v57 = vpop.f32.mrf.mxu0 }
 0x189   :  { %v867_v63 = vadd.f32 %v866_v57, %v796_v61 }
 0x18a   :  { %v868_v60 = vpop.f32.mrf.mxu0 }
 0x18b   :  { %v869_v4 = vadd.f32 %v868_v60, %v798_v62 }
 0x18e   :  { %v937_v1 = vpop.f32.mrf.mxu1  ;;  %v1008_v3 = vpop.f32.mrf.mxu0 }
 0x18f   :  { %v938_v6 = vadd.f32 %v937_v1, %v867_v63 }
 0x190   :  { %v939_v7 = vpop.f32.mrf.mxu1  ;;  %v1010_v9 = vpop.f32.mrf.mxu0 }
 0x191   :  { %v940_v8 = vadd.f32 %v939_v7, %v869_v4  ;;  %v1009_v10 = vadd.f32 %v1008_v3, %v938_v6 }
 0x193   :  { %v1011_v11 = vadd.f32 %v1010_v9, %v940_v8 }
 0x195   :  { %v1018_v13 = vcombine.low %v1009_v10, %v1011_v11 }
 0x197   :  { %1025 = vst.msk [vmem:[%s2293_s3 + $0x8] sm:$0xff] %vm1024_vm3, %v1018_v13 }

</bundles_post_ra>
